<compile_context>
chip_gen: v7x
topology: tpu7x:2x2x1
jax: 0.10.0
libtpu: 0.0.40
codegen_flags: <defaults>
</compile_context>

<pallas_src>
import functools

import jax
import jax.numpy as jnp
from jax.experimental import pallas as pl
from jax.experimental.pallas import tpu as pltpu


def _slstm_cell_kernel(xh_ref, c_ref, n_ref, m_ref, w_ref, b_ref, out_ref,
                       *, hidden_size):
    H = hidden_size

    # Single fused matmul on the MXU: [x | h] @ [W_ih ; W_hh] -> (TB, 4H).
    # Cast the activations to the weight dtype so bf16 weights take the
    # native bf16 MXU path; accumulation stays in f32.
    xh = xh_ref[...].astype(w_ref.dtype)
    gates = jnp.dot(xh, w_ref[...], preferred_element_type=jnp.float32)
    gates = gates + b_ref[...].astype(jnp.float32)

    # Gate order [i, f, z, o]. With H a multiple of 128 these slices are
    # lane-aligned vreg views (no relayout / masking).
    i_pre = gates[:, 0 * H:1 * H]
    f_pre = gates[:, 1 * H:2 * H]
    z_pre = gates[:, 2 * H:3 * H]
    o_pre = gates[:, 3 * H:4 * H]

    z = jnp.tanh(z_pre)
    o = jax.nn.sigmoid(o_pre)

    c_prev = c_ref[...].astype(jnp.float32)
    n_prev = n_ref[...].astype(jnp.float32)
    m_prev = m_ref[...].astype(jnp.float32)

    # Exponential input/forget gates, stabilized in log-space by m.
    m_new = jnp.maximum(f_pre + m_prev, i_pre)
    i_act = jnp.exp(i_pre - m_new)
    f_act = jnp.exp(f_pre + m_prev - m_new)

    c_new = f_act * c_prev + i_act * z
    n_new = f_act * n_prev + i_act
    # EUP approximate reciprocal instead of a divide; the stabilizer keeps
    # max(i_act, f_act) == 1 so n_new is well conditioned for n0 >= 0.
    # TODO(synk): some xLSTM variants use max(|n|, 1) in the denominator.
    h_new = o * (c_new * pl.reciprocal(n_new, approx=True))

    # Single lane-dense output slab ordered [h, c, n, m]; each H-chunk is a
    # lane-aligned unmasked store into one VMEM output block -> one
    # writeback DMA instead of four.
    out_ref[:, 0 * H:1 * H] = h_new.astype(out_ref.dtype)
    out_ref[:, 1 * H:2 * H] = c_new.astype(out_ref.dtype)
    out_ref[:, 2 * H:3 * H] = n_new.astype(out_ref.dtype)
    out_ref[:, 3 * H:4 * H] = m_new.astype(out_ref.dtype)


def fuse_slstm_weights(w_ih, w_hh):
    """Stack [W_ih ; W_hh] -> (input_size + hidden_size, 4*hidden_size).

    Do this once at parameter-setup time (not per step)."""
    return jnp.concatenate([w_ih, w_hh], axis=0)


def slstm_cell(x, h, c, n, m, w_fused, b, *, batch_tile=None):
    """Single sLSTM step. Returns (h_new, c_new, n_new, m_new).

    w_fused: (input_size + hidden_size, 4*hidden_size), f32 or bf16.
    For best performance hidden_size should be a multiple of 128
    (lane-aligned gate slices / unmasked stores)."""
    B, in_size = x.shape
    H = h.shape[1]
    K = in_size + H
    assert w_fused.shape == (K, 4 * H)

    # Cheap (B, K) concat done by XLA in the wrapper, not in-kernel.
    xh = jnp.concatenate([x, h], axis=-1)

    if batch_tile is None:
        batch_tile = B if B <= 128 else 128
    tb = batch_tile
    grid = (pl.cdiv(B, tb),)

    kernel = functools.partial(_slstm_cell_kernel, hidden_size=H)

    w_itemsize = jnp.dtype(w_fused.dtype).itemsize
    cost = pl.CostEstimate(
        flops=2 * B * K * 4 * H,
        transcendentals=5 * B * H,  # 2x exp, tanh, sigmoid, reciprocal
        bytes_accessed=(xh.size * 4 + 3 * B * H * 4          # activations/states in
                        + w_fused.size * w_itemsize + b.size * 4   # params
                        + B * 4 * H * 4),                     # fused output
    )

    # Double-buffered per-step blocks + resident params, with headroom.
    vmem_need = (2 * (tb * K + 3 * tb * H + tb * 4 * H) * 4
                 + 2 * (w_fused.size * w_itemsize + b.size * 4)
                 + (4 << 20))
    # Cap at 64 MiB so the same request is valid on v7x (64 MiB physical);
    # raise toward 128 MiB on v5e/v6e for very large hidden sizes.
    vmem_limit = int(min(max(vmem_need, 32 << 20), 64 << 20))

    out = pl.pallas_call(
        kernel,
        out_shape=jax.ShapeDtypeStruct((B, 4 * H), jnp.float32),
        grid_spec=pltpu.PrefetchScalarGridSpec(
            num_scalar_prefetch=0,
            grid=grid,
            in_specs=[
                pl.BlockSpec((tb, K), lambda i: (i, 0)),   # [x | h]
                pl.BlockSpec((tb, H), lambda i: (i, 0)),   # c
                pl.BlockSpec((tb, H), lambda i: (i, 0)),   # n
                pl.BlockSpec((tb, H), lambda i: (i, 0)),   # m
                # Constant index_maps: weights/bias DMA'd once, VMEM-resident
                # across the batch grid.
                pl.BlockSpec((K, 4 * H), lambda i: (0, 0)),
                pl.BlockSpec((1, 4 * H), lambda i: (0, 0)),
            ],
            out_specs=pl.BlockSpec((tb, 4 * H), lambda i: (i, 0)),
        ),
        compiler_params=pltpu.CompilerParams(
            dimension_semantics=("parallel",),   # shard batch across TCs (v7x)
            vmem_limit_bytes=vmem_limit,
        ),
        cost_estimate=cost,
    )(xh, c, n, m, w_fused, b)

    h_new = out[:, 0 * H:1 * H]
    c_new = out[:, 1 * H:2 * H]
    n_new = out[:, 2 * H:3 * H]
    m_new = out[:, 3 * H:4 * H]
    return h_new, c_new, n_new, m_new


def _reference_slstm(x, h, c, n, m, w_fused, b):
    """Pure-JAX reference (exact divide, highest-precision matmul)."""
    H = h.shape[1]
    xh = jnp.concatenate([x, h], axis=-1)
    gates = jnp.dot(xh, w_fused.astype(jnp.float32),
                    preferred_element_type=jnp.float32,
                    precision=jax.lax.Precision.HIGHEST) + b
    i_pre, f_pre, z_pre, o_pre = (gates[:, k * H:(k + 1) * H] for k in range(4))
    z = jnp.tanh(z_pre)
    o = jax.nn.sigmoid(o_pre)
    m_new = jnp.maximum(f_pre + m, i_pre)
    i_act = jnp.exp(i_pre - m_new)
    f_act = jnp.exp(f_pre + m - m_new)
    c_new = f_act * c + i_act * z
    n_new = f_act * n + i_act
    h_new = o * (c_new / n_new)
    return h_new, c_new, n_new, m_new


if __name__ == "__main__":
    batch = 8
    input_size = 64
    hidden_size = 128   # multiple of 128 -> lane-aligned gates / dense stores

    key = jax.random.PRNGKey(0)
    kx, kh, kc, kwi, kwh, kb = jax.random.split(key, 6)

    x = jax.random.normal(kx, (batch, input_size), dtype=jnp.float32)
    h0 = jax.random.normal(kh, (batch, hidden_size), dtype=jnp.float32) * 0.1
    c0 = jax.random.normal(kc, (batch, hidden_size), dtype=jnp.float32) * 0.1
    n0 = jnp.ones((batch, hidden_size), dtype=jnp.float32)
    m0 = jnp.zeros((batch, hidden_size), dtype=jnp.float32)

    scale_ih = 1.0 / jnp.sqrt(jnp.float32(input_size))
    scale_hh = 1.0 / jnp.sqrt(jnp.float32(hidden_size))
    w_ih = jax.random.uniform(kwi, (input_size, 4 * hidden_size),
                              minval=-scale_ih, maxval=scale_ih,
                              dtype=jnp.float32)
    w_hh = jax.random.uniform(kwh, (hidden_size, 4 * hidden_size),
                              minval=-scale_hh, maxval=scale_hh,
                              dtype=jnp.float32)
    b = jax.random.uniform(kb, (1, 4 * hidden_size),
                           minval=-scale_hh, maxval=scale_hh,
                           dtype=jnp.float32)

    w_fused = fuse_slstm_weights(w_ih, w_hh)

    # --- f32-weight path ---
    h1, c1, n1, m1 = slstm_cell(x, h0, c0, n0, m0, w_fused, b)
    jax.block_until_ready((h1, c1, n1, m1))

    rh, rc, rn, rm = _reference_slstm(x, h0, c0, n0, m0, w_fused, b)
    assert jnp.allclose(c1, rc, atol=1e-3, rtol=1e-3)
    assert jnp.allclose(n1, rn, atol=1e-3, rtol=1e-3)
    assert jnp.allclose(m1, rm, atol=1e-3, rtol=1e-3)
    # h uses the EUP approximate reciprocal -> slightly looser tolerance.
    assert jnp.allclose(h1, rh, atol=1e-2, rtol=1e-2)

    # --- bf16-weight path (native bf16 MXU, f32 accumulation) ---
    h1b, c1b, n1b, m1b = slstm_cell(x, h0, c0, n0, m0,
                                    w_fused.astype(jnp.bfloat16), b)
    jax.block_until_ready((h1b, c1b, n1b, m1b))
    assert bool(jnp.all(jnp.isfinite(h1b)))
    assert jnp.allclose(h1b, rh, atol=1e-1, rtol=1e-1)

    print("KERNEL_OK")
</pallas_src>

<mosaic_0001>
module attributes {stable_mosaic.version = 11 : i64} {
  func.func @_slstm_cell_kernel(%arg0: i32, %arg1: memref<8x192xf32, #tpu.memory_space<vmem>>, %arg2: memref<8x128xf32, #tpu.memory_space<vmem>>, %arg3: memref<8x128xf32, #tpu.memory_space<vmem>>, %arg4: memref<8x128xf32, #tpu.memory_space<vmem>>, %arg5: memref<192x512xf32, #tpu.memory_space<vmem>>, %arg6: memref<1x512xf32, #tpu.memory_space<vmem>>, %arg7: memref<8x512xf32, #tpu.memory_space<vmem>>) attributes {dimension_semantics = [#tpu.dimension_semantics<parallel>], iteration_bounds = array<i64: 1>, scalar_prefetch = 0 : i64, scratch_operands = 0 : i64, tpu.core_type = #tpu.core_type<tc>, window_params = [{transform_indices = @transform_0, window_bounds = array<i64: 8, 192>}, {transform_indices = @transform_1, window_bounds = array<i64: 8, 128>}, {transform_indices = @transform_2, window_bounds = array<i64: 8, 128>}, {transform_indices = @transform_3, window_bounds = array<i64: 8, 128>}, {pipeline_mode = #tpu.pipeline_mode<synchronous>, transform_indices = @transform_4, window_bounds = array<i64: 192, 512>}, {pipeline_mode = #tpu.pipeline_mode<synchronous>, transform_indices = @transform_5, window_bounds = array<i64: 1, 512>}, {transform_indices = @transform_6, window_bounds = array<i64: 8, 512>}]} {
    %c0 = arith.constant 0 : index
    %c0_0 = arith.constant 0 : index
    %0 = vector.load %arg1[%c0, %c0_0] : memref<8x192xf32, #tpu.memory_space<vmem>>, vector<8x192xf32>
    %c0_1 = arith.constant 0 : index
    %c0_2 = arith.constant 0 : index
    %1 = vector.load %arg5[%c0_1, %c0_2] : memref<192x512xf32, #tpu.memory_space<vmem>>, vector<192x512xf32>
    %cst = arith.constant dense<0.000000e+00> : vector<8x512xf32>
    %2 = tpu.matmul %0, %1, %cst {dimension_numbers = #tpu.dot_dimension_numbers<[1], [0], [0], [1], [0, 0, 1, 1], [], []>} : vector<8x192xf32>, vector<192x512xf32>, vector<8x512xf32> -> vector<8x512xf32>
    %c0_3 = arith.constant 0 : index
    %c0_4 = arith.constant 0 : index
    %3 = vector.load %arg6[%c0_3, %c0_4] : memref<1x512xf32, #tpu.memory_space<vmem>>, vector<1x512xf32>
    %4 = vector.broadcast %3 : vector<1x512xf32> to vector<8x512xf32>
    %5 = arith.addf %2, %4 : vector<8x512xf32>
    %6 = vector.extract_strided_slice %5 {offsets = [0, 0], sizes = [8, 128], strides = [1, 1]} : vector<8x512xf32> to vector<8x128xf32>
    %7 = vector.extract_strided_slice %5 {offsets = [0, 128], sizes = [8, 128], strides = [1, 1]} : vector<8x512xf32> to vector<8x128xf32>
    %8 = vector.extract_strided_slice %5 {offsets = [0, 256], sizes = [8, 128], strides = [1, 1]} : vector<8x512xf32> to vector<8x128xf32>
    %9 = vector.extract_strided_slice %5 {offsets = [0, 384], sizes = [8, 128], strides = [1, 1]} : vector<8x512xf32> to vector<8x128xf32>
    %10 = math.tanh %8 : vector<8x128xf32>
    %11 = arith.negf %9 : vector<8x128xf32>
    %12 = math.exp %11 : vector<8x128xf32>
    %cst_5 = arith.constant 1.000000e+00 : f32
    %13 = vector.broadcast %cst_5 : f32 to vector<8x128xf32>
    %14 = arith.addf %13, %12 : vector<8x128xf32>
    %15 = arith.divf %13, %14 : vector<8x128xf32>
    %c0_6 = arith.constant 0 : index
    %c0_7 = arith.constant 0 : index
    %16 = vector.load %arg2[%c0_6, %c0_7] : memref<8x128xf32, #tpu.memory_space<vmem>>, vector<8x128xf32>
    %c0_8 = arith.constant 0 : index
    %c0_9 = arith.constant 0 : index
    %17 = vector.load %arg3[%c0_8, %c0_9] : memref<8x128xf32, #tpu.memory_space<vmem>>, vector<8x128xf32>
    %c0_10 = arith.constant 0 : index
    %c0_11 = arith.constant 0 : index
    %18 = vector.load %arg4[%c0_10, %c0_11] : memref<8x128xf32, #tpu.memory_space<vmem>>, vector<8x128xf32>
    %19 = arith.addf %7, %18 : vector<8x128xf32>
    %20 = arith.maximumf %19, %6 : vector<8x128xf32>
    %21 = arith.subf %6, %20 : vector<8x128xf32>
    %22 = math.exp %21 : vector<8x128xf32>
    %23 = arith.addf %7, %18 : vector<8x128xf32>
    %24 = arith.subf %23, %20 : vector<8x128xf32>
    %25 = math.exp %24 : vector<8x128xf32>
    %26 = arith.mulf %25, %16 : vector<8x128xf32>
    %27 = arith.mulf %22, %10 : vector<8x128xf32>
    %28 = arith.addf %26, %27 : vector<8x128xf32>
    %29 = arith.mulf %25, %17 : vector<8x128xf32>
    %30 = arith.addf %29, %22 : vector<8x128xf32>
    %31 = tpu.reciprocal %30 {approx = true} : vector<8x128xf32> -> vector<8x128xf32>
    %32 = arith.mulf %28, %31 : vector<8x128xf32>
    %33 = arith.mulf %15, %32 : vector<8x128xf32>
    %c0_12 = arith.constant 0 : index
    %c0_13 = arith.constant 0 : index
    %34 = vector.load %arg7[%c0_12, %c0_13] : memref<8x512xf32, #tpu.memory_space<vmem>>, vector<8x128xf32>
    tpu.vector_store %arg7[%c0_12, %c0_13], %33 {strides = array<i32>} : memref<8x512xf32, #tpu.memory_space<vmem>>, vector<8x128xf32>,
    %c0_14 = arith.constant 0 : index
    %c128 = arith.constant 128 : index
    %35 = vector.load %arg7[%c0_14, %c128] : memref<8x512xf32, #tpu.memory_space<vmem>>, vector<8x128xf32>
    tpu.vector_store %arg7[%c0_14, %c128], %28 {strides = array<i32>} : memref<8x512xf32, #tpu.memory_space<vmem>>, vector<8x128xf32>,
    %c0_15 = arith.constant 0 : index
    %c256 = arith.constant 256 : index
    %36 = vector.load %arg7[%c0_15, %c256] : memref<8x512xf32, #tpu.memory_space<vmem>>, vector<8x128xf32>
    tpu.vector_store %arg7[%c0_15, %c256], %30 {strides = array<i32>} : memref<8x512xf32, #tpu.memory_space<vmem>>, vector<8x128xf32>,
    %c0_16 = arith.constant 0 : index
    %c384 = arith.constant 384 : index
    %37 = vector.load %arg7[%c0_16, %c384] : memref<8x512xf32, #tpu.memory_space<vmem>>, vector<8x128xf32>
    tpu.vector_store %arg7[%c0_16, %c384], %20 {strides = array<i32>} : memref<8x512xf32, #tpu.memory_space<vmem>>, vector<8x128xf32>,
    return
  }
  func.func @transform_0(%arg0: i32) -> (i32, i32) {
    %c0_i32 = arith.constant 0 : i32
    %c0_i32_0 = arith.constant 0 : i32
    return %arg0, %c0_i32 : i32, i32
  }
  func.func @transform_1(%arg0: i32) -> (i32, i32) {
    %c0_i32 = arith.constant 0 : i32
    %c0_i32_0 = arith.constant 0 : i32
    return %arg0, %c0_i32 : i32, i32
  }
  func.func @transform_2(%arg0: i32) -> (i32, i32) {
    %c0_i32 = arith.constant 0 : i32
    %c0_i32_0 = arith.constant 0 : i32
    return %arg0, %c0_i32 : i32, i32
  }
  func.func @transform_3(%arg0: i32) -> (i32, i32) {
    %c0_i32 = arith.constant 0 : i32
    %c0_i32_0 = arith.constant 0 : i32
    return %arg0, %c0_i32 : i32, i32
  }
  func.func @transform_4(%arg0: i32) -> (i32, i32) {
    %c0_i32 = arith.constant 0 : i32
    %c0_i32_0 = arith.constant 0 : i32
    %c0_i32_1 = arith.constant 0 : i32
    return %c0_i32, %c0_i32_0 : i32, i32
  }
  func.func @transform_5(%arg0: i32) -> (i32, i32) {
    %c0_i32 = arith.constant 0 : i32
    %c0_i32_0 = arith.constant 0 : i32
    %c0_i32_1 = arith.constant 0 : i32
    return %c0_i32, %c0_i32_0 : i32, i32
  }
  func.func @transform_6(%arg0: i32) -> (i32, i32) {
    %c0_i32 = arith.constant 0 : i32
    %c0_i32_0 = arith.constant 0 : i32
    return %arg0, %c0_i32 : i32, i32
  }
}

</mosaic_0001>

<bundles_post_ra>
// kernel: tpu_custom_call.1
= control target key start
LH: loop header
LB: loop body
LE: loop exit
PB: predicated region body
PF: predicated region fallthrough
CT: control target
= control target key end

     0   :  { %11 = vsyncpa [#allocation3], 0  ;;  %s739_s0 = inlined_call_operand.hbm [shape: f32[8,192], index: 0, kind: input, shape index: {}]   ;;  %s740_s1 = inlined_call_operand.hbm [shape: f32[8,128], index: 1, kind: input, shape index: {}]   ;;  %s741_s2 = inlined_call_operand.hbm [shape: f32[8,128], index: 2, kind: input, shape index: {}]   ;;  %s742_s3 = inlined_call_operand.vmem [shape: f32[8,128], index: 3, kind: input, shape index: {}]   ;;  %s743_s4 = inlined_call_operand.hbm [shape: f32[192,512], index: 4, kind: input, shape index: {}]   ;;  %s744_s5 = inlined_call_operand.vmem [shape: f32[1,512], index: 5, kind: input, shape index: {}]   ;;  %s745_s6 = inlined_call_operand.hbm [shape: f32[8,512], index: 6, kind: output, shape index: {}]  }
   0x1   :  { %12 = vsyncpa [#allocation6], 0 }
   0x2   :  { %13 = vsyncpa [#allocation9], 0 }
   0x3   :  { %14 = vsyncpa [#allocation4], 0  ;;  %s622_s21 = smov [#allocation5]   ;;  %s623_s23 = smov [#allocation2]  }
   0x4   :  { %s31_s22 = sshll.u32 %s622_s21, 4  ;;  %s21_s24 = sshll.u32 %s623_s23, 4  ;;  %s32_s22 = int_to_ptr.vmem [resolvable:$true] %s31_s22  ;;  %s22_s24 = int_to_ptr.vmem [resolvable:$true] %s21_s24 }
   0x5   :  { %s504_s27 = scalar_lea.hbm %s740_s1, 128 }
   0x6   :  { %p505_p0 = scmp.ne.s32.totalorder %s740_s1, %s504_s27  ;;  %p508_p1 = scmp.lt.u32.totalorder %s504_s27, %s740_s1 }
   0x8   :  { %p510_p2 = pnand %p508_p1, %p505_p0 }
   0xa   :  { %513 = shalt.err (!%p510_p2)
}
   0xb   :  { %s514_s8 = scalar_lea.vmem %s32_s22, 128  ;;  %p519_p4 = scmp.lt.s32.totalorder %s32_s22, %s32_s22 }
   0xc   :  { %p515_p3 = scmp.ne.s32.totalorder %s32_s22, %s514_s8  ;;  %p520_p5 = scmp.lt.s32.totalorder %s514_s8, %s514_s8 }
   0xe   :  { %p521_p6 = por %p520_p5, %p519_p4 }
  0x10   :  { %p522_p7 = pnand %p521_p6, %p515_p3 }
  0x12   :  { %525 = shalt.err (!%p522_p7)
}
  0x13   :  { %34 = dma.hbm_to_vmem [thread:$0]  %s740_s1, 128, %s32_s22, [#allocation6]  }
  0x14   :  { %s526_s13 = scalar_lea.hbm %s739_s0, 256 }
  0x15   :  { %p527_p8 = scmp.ne.s32.totalorder %s739_s0, %s526_s13  ;;  %p530_p9 = scmp.lt.u32.totalorder %s526_s13, %s739_s0 }
  0x17   :  { %p532_p10 = pnand %p530_p9, %p527_p8 }
  0x19   :  { %535 = shalt.err (!%p532_p10)
}
  0x1a   :  { %s536_s18 = scalar_lea.vmem %s22_s24, 256  ;;  %p541_p12 = scmp.lt.s32.totalorder %s22_s24, %s22_s24 }
  0x1b   :  { %p537_p11 = scmp.ne.s32.totalorder %s22_s24, %s536_s18  ;;  %p542_p13 = scmp.lt.s32.totalorder %s536_s18, %s536_s18 }
  0x1d   :  { %p543_p0 = por %p542_p13, %p541_p12 }
  0x1f   :  { %p544_p1 = pnand %p543_p0, %p537_p11 }
  0x21   :  { %547 = shalt.err (!%p544_p1)
}
  0x22   :  { %24 = dma.hbm_to_vmem [thread:$0]  %s739_s0, 256, %s22_s24, [#allocation3]  }
  0x23   :  { %s624_s20 = smov [#allocation7]   ;;  %s625_s22 = smov [#allocation8]  }
  0x24   :  { %s41_s21 = sshll.u32 %s624_s20, 4  ;;  %s52_s23 = sshll.u32 %s625_s22, 4  ;;  %s42_s21 = int_to_ptr.vmem [resolvable:$true] %s41_s21  ;;  %s688_s23 = int_to_ptr.vmem [resolvable:$true] %s52_s23 }
  0x25   :  { %s548_s27 = scalar_lea.hbm %s741_s2, 128 }
  0x26   :  { %p549_p2 = scmp.ne.s32.totalorder %s741_s2, %s548_s27  ;;  %p552_p3 = scmp.lt.u32.totalorder %s548_s27, %s741_s2 }
  0x28   :  { %p554_p4 = pnand %p552_p3, %p549_p2 }
  0x2a   :  { %557 = shalt.err (!%p554_p4)
}
  0x2b   :  { %s558_s0 = scalar_lea.vmem %s42_s21, 128  ;;  %p563_p6 = scmp.lt.s32.totalorder %s42_s21, %s42_s21 }
  0x2c   :  { %p559_p5 = scmp.ne.s32.totalorder %s42_s21, %s558_s0  ;;  %p564_p7 = scmp.lt.s32.totalorder %s558_s0, %s558_s0 }
  0x2e   :  { %p565_p8 = por %p564_p7, %p563_p6 }
  0x30   :  { %p566_p9 = pnand %p565_p8, %p559_p5 }
  0x32   :  { %569 = shalt.err (!%p566_p9)
}
  0x33   :  { %44 = dma.hbm_to_vmem [thread:$0]  %s741_s2, 128, %s42_s21, [#allocation6]  }
  0x34   :  { %s570_s11 = scalar_lea.hbm %s743_s4, 12288 }
  0x35   :  { %p571_p10 = scmp.ne.s32.totalorder %s743_s4, %s570_s11  ;;  %p574_p11 = scmp.lt.u32.totalorder %s570_s11, %s743_s4 }
  0x37   :  { %p576_p12 = pnand %p574_p11, %p571_p10 }
  0x39   :  { %579 = shalt.err (!%p576_p12)
}
  0x3a   :  { %s580_s16 = scalar_lea.vmem %s688_s23, 12288  ;;  %p585_p0 = scmp.lt.s32.totalorder %s688_s23, %s688_s23 }
  0x3b   :  { %p581_p13 = scmp.ne.s32.totalorder %s688_s23, %s580_s16  ;;  %p586_p1 = scmp.lt.s32.totalorder %s580_s16, %s580_s16 }
  0x3d   :  { %p587_p2 = por %p586_p1, %p585_p0 }
  0x3f   :  { %p588_p3 = pnand %p587_p2, %p581_p13 }
  0x41   :  { %591 = shalt.err (!%p588_p3)
}
  0x42   :  { %s626_s2 = smov 512   ;;  %s627_s17 = smov 32  }
  0x43   :  { %58 = dma.hbm_to_vmem [thread:$0]  %s743_s4, 12288, %s688_s23, [#allocation9], %s626_s2, %s626_s2, %s627_s17  }
  0x44   :  { %614 = dma.done.wait [#allocation3], 256  }
  0x45   :  { %615 = vsyncadd [#allocation3], 4294967040 }
  0x46   :  { %616 = dma.done.wait [#allocation6], 256  }
  0x47   :  { %617 = vsyncadd [#allocation6], 4294967040 }
  0x48   :  { %618 = dma.done.wait [#allocation9], 12288  }
  0x49   :  { %619 = vsyncadd [#allocation9], 4294955008  ;;  %v76_v0 = vld [vmem:[#allocation8 + $0x8] sm:$0xff]  ;;  %v75_v2 = vld [vmem:[#allocation8] sm:$0xff]  ;;  %vm193_vm0 = vcmask 523264  }
  0x4a   :  { %v80_v1 = vld [vmem:[#allocation8 + $0x28] sm:$0xff]  ;;  %v79_v4 = vld [vmem:[#allocation8 + $0x20] sm:$0xff]  ;;  %v78_v14 = vld [vmem:[#allocation8 + $0x18] sm:$0xff] }
  0x4b   :  { %v389_v3 = vpack.c.bf16 %v80_v1, %v76_v0  ;;  %v84_v5 = vld [vmem:[#allocation8 + $0x48] sm:$0xff]  ;;  %v391_v7 = vpack.c.bf16 %v79_v4, %v75_v2  ;;  %v83_v9 = vld [vmem:[#allocation8 + $0x40] sm:$0xff]  ;;  %v82_v15 = vld [vmem:[#allocation8 + $0x38] sm:$0xff] }
  0x4c   :  { %v88_v6 = vld [vmem:[#allocation8 + $0x68] sm:$0xff]  ;;  %v87_v10 = vld [vmem:[#allocation8 + $0x60] sm:$0xff]  ;;  %v77_v16 = vld [vmem:[#allocation8 + $0x10] sm:$0xff]  ;;  %v437_v20 = vpack.c.bf16 %v82_v15, %v78_v14 }
  0x4d   :  { %v393_v8 = vpack.c.bf16 %v88_v6, %v84_v5  ;;  %v92_v11 = vld [vmem:[#allocation8 + $0x88] sm:$0xff]  ;;  %390 = vmatprep.subr.bf16.mxu0 %v389_v3  ;;  %v395_v13 = vpack.c.bf16 %v87_v10, %v83_v9  ;;  %v91_v18 = vld [vmem:[#allocation8 + $0x80] sm:$0xff]  ;;  %v81_v21 = vld [vmem:[#allocation8 + $0x30] sm:$0xff] }
  0x4e   :  { %v96_v12 = vld [vmem:[#allocation8 + $0xa8] sm:$0xff]  ;;  %392 = vmatpush1.bf16.msra.mxu0 %v391_v7  ;;  %v95_v19 = vld [vmem:[#allocation8 + $0xa0] sm:$0xff]  ;;  %v439_v22 = vpack.c.bf16 %v81_v21, %v77_v16  ;;  %v86_v25 = vld [vmem:[#allocation8 + $0x58] sm:$0xff]  ;;  %438 = vmatprep.subr.bf16.mxu1 %v437_v20 }
  0x4f   :  { %394 = vmatprep.subr.bf16.mxu0 %v393_v8  ;;  %v397_v17 = vpack.c.bf16 %v96_v12, %v92_v11  ;;  %v100_v23 = vld [vmem:[#allocation8 + $0xc8] sm:$0xff]  ;;  %v90_v26 = vld [vmem:[#allocation8 + $0x78] sm:$0xff]  ;;  %v85_v27 = vld [vmem:[#allocation8 + $0x50] sm:$0xff]  ;;  %v399_v29 = vpack.c.bf16 %v95_v19, %v91_v18 }
  0x50   :  { %v104_v24 = vld [vmem:[#allocation8 + $0xe8] sm:$0xff]  ;;  %v89_v28 = vld [vmem:[#allocation8 + $0x70] sm:$0xff]  ;;  %440 = vmatpush1.bf16.msra.mxu1 %v439_v22  ;;  %v99_v30 = vld [vmem:[#allocation8 + $0xc0] sm:$0xff]  ;;  %v441_v32 = vpack.c.bf16 %v90_v26, %v86_v25 }
  0x51   :  { %v103_v31 = vld [vmem:[#allocation8 + $0xe0] sm:$0xff]  ;;  %v443_v33 = vpack.c.bf16 %v89_v28, %v85_v27  ;;  %v401_v34 = vpack.c.bf16 %v104_v24, %v100_v23  ;;  %v108_v35 = vld [vmem:[#allocation8 + $0x108] sm:$0xff]  ;;  %v94_v36 = vld [vmem:[#allocation8 + $0x98] sm:$0xff] }
  0x52   :  { %396 = vmatpush1.bf16.msra.mxu0 %v395_v13  ;;  %v98_v37 = vld [vmem:[#allocation8 + $0xb8] sm:$0xff]  ;;  %442 = vmatprep.subr.bf16.mxu1 %v441_v32  ;;  %v112_v38 = vld [vmem:[#allocation8 + $0x128] sm:$0xff]  ;;  %v93_v40 = vld [vmem:[#allocation8 + $0x90] sm:$0xff]  ;;  %v403_v42 = vpack.c.bf16 %v103_v31, %v99_v30 }
  0x53   :  { %398 = vmatprep.subr.bf16.mxu0 %v397_v17  ;;  %v445_v39 = vpack.c.bf16 %v98_v37, %v94_v36  ;;  %v97_v41 = vld [vmem:[#allocation8 + $0xb0] sm:$0xff]  ;;  %v107_v43 = vld [vmem:[#allocation8 + $0x100] sm:$0xff]  ;;  %v102_v45 = vld [vmem:[#allocation8 + $0xd8] sm:$0xff]  ;;  %v405_v47 = vpack.c.bf16 %v112_v38, %v108_v35 }
  0x54   :  { %444 = vmatpush1.bf16.msra.mxu1 %v443_v33  ;;  %v447_v44 = vpack.c.bf16 %v97_v41, %v93_v40  ;;  %v106_v46 = vld [vmem:[#allocation8 + $0xf8] sm:$0xff]  ;;  %v111_v48 = vld [vmem:[#allocation8 + $0x120] sm:$0xff]  ;;  %v101_v50 = vld [vmem:[#allocation8 + $0xd0] sm:$0xff] }
  0x55   :  { %446 = vmatprep.subr.bf16.mxu1 %v445_v39  ;;  %v449_v49 = vpack.c.bf16 %v106_v46, %v102_v45  ;;  %v105_v51 = vld [vmem:[#allocation8 + $0xf0] sm:$0xff]  ;;  %v116_v52 = vld [vmem:[#allocation8 + $0x148] sm:$0xff]  ;;  %v110_v54 = vld [vmem:[#allocation8 + $0x118] sm:$0xff]  ;;  %v407_v56 = vpack.c.bf16 %v111_v48, %v107_v43 }
  0x56   :  { %400 = vmatpush1.bf16.msra.mxu0 %v399_v29  ;;  %v120_v53 = vld [vmem:[#allocation8 + $0x168] sm:$0xff]  ;;  %v114_v55 = vld [vmem:[#allocation8 + $0x138] sm:$0xff]  ;;  %v115_v57 = vld [vmem:[#allocation8 + $0x140] sm:$0xff]  ;;  %v451_v59 = vpack.c.bf16 %v105_v51, %v101_v50 }
  0x57   :  { %402 = vmatprep.subr.bf16.mxu0 %v401_v34  ;;  %v119_v58 = vld [vmem:[#allocation8 + $0x160] sm:$0xff]  ;;  %v409_v60 = vpack.c.bf16 %v120_v53, %v116_v52  ;;  %v124_v61 = vld [vmem:[#allocation8 + $0x188] sm:$0xff]  ;;  %v453_v62 = vpack.c.bf16 %v114_v55, %v110_v54  ;;  %v109_v63 = vld [vmem:[#allocation8 + $0x110] sm:$0xff] }
  0x58   :  { %448 = vmatpush1.bf16.msra.mxu1 %v447_v44  ;;  %v113_v0 = vld [vmem:[#allocation8 + $0x130] sm:$0xff]  ;;  %v128_v1 = vld [vmem:[#allocation8 + $0x1a8] sm:$0xff]  ;;  %v118_v2 = vld [vmem:[#allocation8 + $0x158] sm:$0xff]  ;;  %v411_v4 = vpack.c.bf16 %v119_v58, %v115_v57 }
  0x59   :  { %450 = vmatprep.subr.bf16.mxu1 %v449_v49  ;;  %v122_v3 = vld [vmem:[#allocation8 + $0x178] sm:$0xff]  ;;  %v123_v5 = vld [vmem:[#allocation8 + $0x180] sm:$0xff]  ;;  %v455_v7 = vpack.c.bf16 %v113_v0, %v109_v63  ;;  %v413_v8 = vpack.c.bf16 %v128_v1, %v124_v61  ;;  %v132_v9 = vld [vmem:[#allocation8 + $0x1c8] sm:$0xff] }
  0x5a   :  { %404 = vmatpush1.bf16.msra.mxu0 %v403_v42  ;;  %v127_v6 = vld [vmem:[#allocation8 + $0x1a0] sm:$0xff]  ;;  %v457_v10 = vpack.c.bf16 %v122_v3, %v118_v2  ;;  %v117_v11 = vld [vmem:[#allocation8 + $0x150] sm:$0xff]  ;;  %v136_v13 = vld [vmem:[#allocation8 + $0x1e8] sm:$0xff] }
  0x5b   :  { %406 = vmatprep.subr.bf16.mxu0 %v405_v47  ;;  %v121_v12 = vld [vmem:[#allocation8 + $0x170] sm:$0xff]  ;;  %v126_v14 = vld [vmem:[#allocation8 + $0x198] sm:$0xff]  ;;  %v415_v16 = vpack.c.bf16 %v127_v6, %v123_v5  ;;  %v131_v17 = vld [vmem:[#allocation8 + $0x1c0] sm:$0xff]  ;;  %v417_v20 = vpack.c.bf16 %v136_v13, %v132_v9 }
  0x5c   :  { %452 = vmatpush1.bf16.msra.mxu1 %v451_v59  ;;  %v130_v15 = vld [vmem:[#allocation8 + $0x1b8] sm:$0xff]  ;;  %v135_v18 = vld [vmem:[#allocation8 + $0x1e0] sm:$0xff]  ;;  %v459_v19 = vpack.c.bf16 %v121_v12, %v117_v11  ;;  %v140_v21 = vld [vmem:[#allocation8 + $0x208] sm:$0xff] }
  0x5d   :  { %454 = vmatprep.subr.bf16.mxu1 %v453_v62  ;;  %v461_v22 = vpack.c.bf16 %v130_v15, %v126_v14  ;;  %v125_v23 = vld [vmem:[#allocation8 + $0x190] sm:$0xff]  ;;  %v144_v25 = vld [vmem:[#allocation8 + $0x228] sm:$0xff]  ;;  %v134_v26 = vld [vmem:[#allocation8 + $0x1d8] sm:$0xff]  ;;  %v419_v28 = vpack.c.bf16 %v135_v18, %v131_v17  ;;  %v173_v18 = vlaneseq }
  0x5e   :  { %408 = vmatpush1.bf16.msra.mxu0 %v407_v56  ;;  %v129_v24 = vld [vmem:[#allocation8 + $0x1b0] sm:$0xff]  ;;  %v138_v27 = vld [vmem:[#allocation8 + $0x1f8] sm:$0xff]  ;;  %v139_v29 = vld [vmem:[#allocation8 + $0x200] sm:$0xff]  ;;  %v421_v33 = vpack.c.bf16 %v144_v25, %v140_v21 }
  0x5f   :  { %410 = vmatprep.subr.bf16.mxu0 %v409_v60  ;;  %v143_v30 = vld [vmem:[#allocation8 + $0x220] sm:$0xff]  ;;  %v463_v31 = vpack.c.bf16 %v129_v24, %v125_v23  ;;  %v148_v32 = vld [vmem:[#allocation8 + $0x248] sm:$0xff]  ;;  %v465_v34 = vpack.c.bf16 %v138_v27, %v134_v26  ;;  %v133_v35 = vld [vmem:[#allocation8 + $0x1d0] sm:$0xff] }
  0x60   :  { %456 = vmatpush1.bf16.msra.mxu1 %v455_v7  ;;  %v137_v36 = vld [vmem:[#allocation8 + $0x1f0] sm:$0xff]  ;;  %v74_v37 = vld [vmem:[#allocation2 + $0x8] sm:$0xff]  ;;  %v142_v39 = vld [vmem:[#allocation8 + $0x218] sm:$0xff]  ;;  %v423_v41 = vpack.c.bf16 %v143_v30, %v139_v29 }
  0x61   :  { %458 = vmatprep.subr.bf16.mxu1 %v457_v10  ;;  %v152_v38 = vld [vmem:[#allocation8 + $0x268] sm:$0xff]  ;;  %v146_v40 = vld [vmem:[#allocation8 + $0x238] sm:$0xff]  ;;  %386 = vmatprep.mubr.msk.f32.mxu0 %vm193_vm0, %v74_v37  ;;  %v147_v42 = vld [vmem:[#allocation8 + $0x240] sm:$0xff]  ;;  %v467_v44 = vpack.c.bf16 %v137_v36, %v133_v35 }
  0x62   :  { %412 = vmatpush1.bf16.msra.mxu0 %v411_v4  ;;  %387 = vmatprep.mubr.msk.f32.mxu1 %vm193_vm0, %v74_v37  ;;  %v151_v43 = vld [vmem:[#allocation8 + $0x260] sm:$0xff]  ;;  %v425_v45 = vpack.c.bf16 %v152_v38, %v148_v32  ;;  %v156_v46 = vld [vmem:[#allocation8 + $0x288] sm:$0xff]  ;;  %v469_v47 = vpack.c.bf16 %v146_v40, %v142_v39  ;;  %v141_v48 = vld [vmem:[#allocation8 + $0x210] sm:$0xff] }
  0x63   :  { %414 = vmatprep.subr.bf16.mxu0 %v413_v8  ;;  %v145_v49 = vld [vmem:[#allocation8 + $0x230] sm:$0xff]  ;;  %v160_v50 = vld [vmem:[#allocation8 + $0x2a8] sm:$0xff]  ;;  %v150_v51 = vld [vmem:[#allocation8 + $0x258] sm:$0xff]  ;;  %v427_v53 = vpack.c.bf16 %v151_v43, %v147_v42 }
  0x64   :  { %460 = vmatpush1.bf16.msra.mxu1 %v459_v19  ;;  %v154_v52 = vld [vmem:[#allocation8 + $0x278] sm:$0xff]  ;;  %v155_v54 = vld [vmem:[#allocation8 + $0x280] sm:$0xff]  ;;  %v471_v56 = vpack.c.bf16 %v145_v49, %v141_v48  ;;  %v429_v57 = vpack.c.bf16 %v160_v50, %v156_v46  ;;  %v164_v58 = vld [vmem:[#allocation8 + $0x2c8] sm:$0xff]  ;;  %v174_v19 = vshrl.u32 %v173_v18, 7 }
  0x65   :  { %462 = vmatprep.subr.bf16.mxu1 %v461_v22  ;;  %v159_v55 = vld [vmem:[#allocation8 + $0x2a0] sm:$0xff]  ;;  %v473_v59 = vpack.c.bf16 %v154_v52, %v150_v51  ;;  %v149_v60 = vld [vmem:[#allocation8 + $0x250] sm:$0xff]  ;;  %v168_v62 = vld [vmem:[#allocation8 + $0x2e8] sm:$0xff] }
  0x66   :  { %416 = vmatpush1.bf16.msra.mxu0 %v415_v16  ;;  %v153_v61 = vld [vmem:[#allocation8 + $0x270] sm:$0xff]  ;;  %v158_v63 = vld [vmem:[#allocation8 + $0x298] sm:$0xff]  ;;  %v431_v1 = vpack.c.bf16 %v159_v55, %v155_v54  ;;  %v163_v2 = vld [vmem:[#allocation8 + $0x2c0] sm:$0xff]  ;;  %v433_v4 = vpack.c.bf16 %v168_v62, %v164_v58  ;;  %v175_v22 = vsub.s32 0, %v174_v19  ;;  %v183_v23 = vsub.s32 2, %v174_v19 }
  0x67   :  { %418 = vmatprep.subr.bf16.mxu0 %v417_v20  ;;  %v162_v0 = vld [vmem:[#allocation8 + $0x2b8] sm:$0xff]  ;;  %v475_v3 = vpack.c.bf16 %v153_v61, %v149_v60  ;;  %v167_v5 = vld [vmem:[#allocation8 + $0x2e0] sm:$0xff]  ;;  %v157_v7 = vld [vmem:[#allocation8 + $0x290] sm:$0xff]  ;;  %v179_v20 = vsub.s32 1, %v174_v19  ;;  %v187_v25 = vsub.s32 3, %v174_v19 }
  0x68   :  { %464 = vmatpush1.bf16.msra.mxu1 %v463_v31  ;;  %v477_v6 = vpack.c.bf16 %v162_v0, %v158_v63  ;;  %v161_v8 = vld [vmem:[#allocation8 + $0x2b0] sm:$0xff]  ;;  %v166_v9 = vld [vmem:[#allocation8 + $0x2d8] sm:$0xff]  ;;  %v435_v11 = vpack.c.bf16 %v167_v5, %v163_v2  ;;  %v73_v16 = vld [vmem:[#allocation2] sm:$0xff] }
  0x69   :  { %466 = vmatprep.subr.bf16.mxu1 %v465_v34  ;;  %v170_v10 = vld [vmem:[#allocation8 + $0x2f8] sm:$0xff]  ;;  %v479_v12 = vpack.c.bf16 %v161_v8, %v157_v7  ;;  %v165_v14 = vld [vmem:[#allocation8 + $0x2d0] sm:$0xff]  ;;  %v171_v21 = vld [vmem:[%s744_s5] sm:$0xf] }
  0x6a   :  { %420 = vmatpush1.bf16.msra.mxu0 %v419_v28  ;;  %v481_v13 = vpack.c.bf16 %v170_v10, %v166_v9  ;;  %v169_v15 = vld [vmem:[#allocation8 + $0x2f0] sm:$0xff]  ;;  %v180_v24 = vrot.slane %v171_v21, %v179_v20  ;;  %v176_v26 = vrot.slane %v171_v21, %v175_v22  ;;  %v348_v29 = vld [vmem:[%s742_s3] sm:$0xff]  ;;  %v184_v30 = vrot.slane %v171_v21, %v183_v23  ;;  %v347_v48 = vld [vmem:[#allocation7] sm:$0xff]  ;;  %s628_s3 = smov [#allocation10]  }
  0x6b   :  { %422 = vmatprep.subr.bf16.mxu0 %v421_v33  ;;  %v483_v17 = vpack.c.bf16 %v169_v15, %v165_v14  ;;  %v188_v32 = vrot.slane %v171_v21, %v187_v25  ;;  %s375_s5 = sshll.u32 %s628_s3, 4  ;;  %s376_s5 = int_to_ptr.vmem [resolvable:$true] %s375_s5 }
  0x6c   :  { %468 = vmatpush1.bf16.msra.mxu1 %v467_v44  ;;  %s592_s22 = scalar_lea.vmem %s376_s5, 512  ;;  %p597_p5 = scmp.lt.s32.totalorder %s376_s5, %s376_s5 }
  0x6d   :  { %470 = vmatprep.subr.bf16.mxu1 %v469_v47  ;;  %v346_v47 = vld [vmem:[#allocation5] sm:$0xff]  ;;  %p593_p4 = scmp.ne.s32.totalorder %s376_s5, %s592_s22  ;;  %p598_p6 = scmp.lt.s32.totalorder %s592_s22, %s592_s22 }
  0x6e   :  { %424 = vmatpush1.bf16.msra.mxu0 %v423_v41 }
  0x6f   :  { %426 = vmatprep.subr.bf16.mxu0 %v425_v45  ;;  %p599_p7 = por %p598_p6, %p597_p5 }
  0x70   :  { %472 = vmatpush1.bf16.msra.mxu1 %v471_v56 }
  0x71   :  { %474 = vmatprep.subr.bf16.mxu1 %v473_v59  ;;  %p600_p8 = pnand %p599_p7, %p593_p4 }
  0x72   :  { %428 = vmatpush1.bf16.msra.mxu0 %v427_v53 }
  0x73   :  { %430 = vmatprep.subr.bf16.mxu0 %v429_v57 }
  0x74   :  { %476 = vmatpush1.bf16.msra.mxu1 %v475_v3 }
  0x75   :  { %478 = vmatprep.subr.bf16.mxu1 %v477_v6 }
  0x76   :  { %432 = vmatpush1.bf16.msra.mxu0 %v431_v1 }
  0x77   :  { %434 = vmatprep.subr.bf16.mxu0 %v433_v4 }
  0x78   :  { %480 = vmatpush1.bf16.msra.mxu1 %v479_v12 }
  0x79   :  { %482 = vmatprep.subr.bf16.mxu1 %v481_v13 }
  0x7a   :  { %436 = vmatpush1.bf16.msra.mxu0 %v435_v11 }
  0x7c   :  { %484 = vmatpush1.bf16.msra.mxu1 %v483_v17 }
  0x7d   :  { %262 = vmatmul.mubr.f32.vlgmr.msra.gmra.mrb[0].mxu0 %v73_v16 }
  0x7f   :  { %333 = vmatmul.mubr.f32.vlgmr.msra.gmra.mrb[0].mxu1 %v73_v16 }
 0x150   :  { %v263_v27 = vpop.f32.mrb[0].mxu0 }
 0x151   :  { %v265_v28 = vpop.f32.mrb[1].mxu0  ;;  %v264_v33 = vadd.f32 %v263_v27, %v176_v26 }
 0x152   :  { %v266_v31 = vadd.f32 %v265_v28, %v180_v24  ;;  %v334_v35 = vpop.f32.mrb[0].mxu1 }
 0x153   :  { %v335_v36 = vadd.f32 %v334_v35, %v184_v30  ;;  %v336_v37 = vpop.f32.mrb[1].mxu1 }
 0x154   :  { %v349_v34 = vadd.f32 %v348_v29, %v266_v31  ;;  %v337_v39 = vadd.f32 %v336_v37, %v188_v32 }
 0x155   :  { %492 = vtanh.f32 %v335_v36 }
 0x156   :  { %v350_v38 = vmax.f32 %v349_v34, %v264_v33  ;;  %v388_v42 = vmul.f32 -1.442695, %v337_v39 }
 0x158   :  { %v351_v40 = vsub.f32 %v264_v33, %v350_v38  ;;  %v354_v41 = vsub.f32 %v349_v34, %v350_v38  ;;  %368 = vst [vmem:[#allocation10 + $0x18] sm:$0xff] %v350_v38  ;;  %494 = vpow2.f32 %v388_v42 }
 0x15a   :  { %v352_v43 = vmul.f32 1.442695, %v351_v40  ;;  %v355_v44 = vmul.f32 1.442695, %v354_v41 }
 0x15c   :  { %496 = vpow2.f32 %v352_v43 }
 0x15d   :  { %498 = vpow2.f32 %v355_v44 }
 0x15f   :  { %v493_v45 = vpop.eup %492 }
 0x162   :  { %v495_v46 = vpop.eup %494 }
 0x163   :  { %v343_v52 = vadd.f32 1.0, %v495_v46 }
 0x165   :  { %500 = vrcp.f32 %v343_v52 }
 0x166   :  { %v497_v49 = vpop.eup %496 }
 0x167   :  { %v499_v50 = vpop.eup %498  ;;  %v358_v51 = vmul.f32 %v497_v49, %v493_v45 }
 0x168   :  { %v357_v53 = vmul.f32 %v499_v50, %v346_v47  ;;  %v360_v54 = vmul.f32 %v499_v50, %v347_v48 }
 0x16a   :  { %v359_v55 = vadd.f32 %v358_v51, %v357_v53  ;;  %v361_v56 = vadd.f32 %v497_v49, %v360_v54 }
 0x16c   :  { %502 = vrcp.f32 %v361_v56  ;;  %366 = vst [vmem:[#allocation10 + $0x8] sm:$0xff] %v359_v55  ;;  %367 = vst [vmem:[#allocation10 + $0x10] sm:$0xff] %v361_v56 }
 0x16f   :  { %v501_v57 = vpop.eup %500 }
 0x176   :  { %v503_v58 = vpop.eup %502 }
 0x177   :  { %v363_v59 = vmul.f32 %v503_v58, %v359_v55 }
 0x179   :  { %v364_v60 = vmul.f32 %v501_v57, %v363_v59 }
 0x17b   :  { %365 = vst [vmem:[#allocation10] sm:$0xff] %v364_v60 }
 0x17c   :  { %603 = shalt.err (!%p600_p8)
}
 0x17d   :  { %s604_s26 = scalar_lea.hbm %s745_s6, 512 }
 0x17e   :  { %p605_p9 = scmp.ne.s32.totalorder %s745_s6, %s604_s26  ;;  %p608_p10 = scmp.lt.u32.totalorder %s604_s26, %s745_s6 }
 0x180   :  { %p610_p11 = pnand %p608_p10, %p605_p9 }
 0x182   :  { %613 = shalt.err (!%p610_p11)
}
 0x183   :  { %378 = dma.vmem_to_hbm [thread:$0]  %s376_s5, 512, %s745_s6, [#allocation4]  }
 0x184   :  { %620 = dma.done.wait [#allocation4], 512  }
 0x185   :  { %621 = vsyncadd [#allocation4], 4294966784 }
 0x186   :  { %382 = vsyncpa [#allocation3], 1 }
 0x187   :  { %383 = vsyncpa [#allocation6], 1 }
 0x188   :  { %384 = vsyncpa [#allocation9], 1 }
 0x189   :  { %385 = vsyncpa [#allocation4], 1 }

</bundles_post_ra>
